<compile_context>
chip_gen: v7x
topology: tpu7x:2x2x1
jax: 0.10.0
libtpu: 0.0.40
codegen_flags: <defaults>
</compile_context>

<pallas_src>
import jax
import jax.numpy as jnp
from jax.experimental import pallas as pl
from jax.experimental.pallas import tpu as pltpu


def _round_up(v, m):
    return (v + m - 1) // m * m


def _linear_kernel_bias(x_ref, w_ref, b_ref, o_ref, acc_ref):
    # x_ref: (tm, tk), w_ref: (tk, tn) pre-transposed weight, b_ref: (1, tn) f32,
    # o_ref: (tm, tn), acc_ref: (tm, tn) f32 scratch.
    k = pl.program_id(2)

    @pl.when(k == 0)
    def _():
        acc_ref[...] = jnp.zeros_like(acc_ref)

    # Plain (tm,tk) x (tk,tn) matmul -> maps straight onto the MXU, no transpose.
    acc_ref[...] += jnp.dot(x_ref[...], w_ref[...],
                            preferred_element_type=jnp.float32)

    @pl.when(k == pl.num_programs(2) - 1)
    def _():
        # bias add + downcast exactly once, in the finalize branch
        o_ref[...] = (acc_ref[...] + b_ref[...]).astype(o_ref.dtype)


def _linear_kernel_nobias(x_ref, w_ref, o_ref, acc_ref):
    k = pl.program_id(2)

    @pl.when(k == 0)
    def _():
        acc_ref[...] = jnp.zeros_like(acc_ref)

    acc_ref[...] += jnp.dot(x_ref[...], w_ref[...],
                            preferred_element_type=jnp.float32)

    @pl.when(k == pl.num_programs(2) - 1)
    def _():
        o_ref[...] = acc_ref[...].astype(o_ref.dtype)


def linear_forward(x, weight, bias=None, *, tm=None, tk=None, tn=None,
                   compute_dtype=None):
    """Affine transform matching torch's `x @ weight.T (+ bias)`.

    x:      (*, in_features)
    weight: (out_features, in_features)   -- PyTorch layout
    bias:   (out_features,) or None
    compute_dtype: optional MXU datapath dtype (e.g. jnp.bfloat16); accumulation
                   is always f32 and the output dtype matches x.dtype.
    returns (*, out_features)
    """
    *lead, K = x.shape
    N = weight.shape[0]
    M = 1
    for d in lead:
        M *= d
    x2d = x.reshape(M, K)
    out_dtype = x.dtype

    # Tiny shapes: fixed per-grid-step cost + (8,128) padding waste dominates;
    # a single fused XLA dot is faster there.
    if M < 8 or K < 128 or N < 128:
        out2d = x2d @ weight.T
        if bias is not None:
            out2d = out2d + bias
        return out2d.reshape(*lead, N)

    cdt = jnp.dtype(compute_dtype) if compute_dtype is not None else jnp.dtype(x.dtype)
    c_item = cdt.itemsize
    sub_m = 16 if c_item == 2 else 8   # 16-bit dtypes pack 16 sublanes / vreg

    # --- tile selection ----------------------------------------------------
    # Caps keep the double-buffered working set ~10-12 MiB: inside the scoped
    # VMEM defaults on v5e (16 MiB), v6e (32 MiB) and v7x (32 of 64 MiB
    # physical per TC), while being much larger than the old 256/512 caps so
    # weight/x HBM re-streaming and per-step overhead drop sharply. tk=1024
    # halves the number of accumulator read-modify-write round-trips per tile.
    auto_tn = tn is None
    if tm is None:
        tm = min(512, _round_up(M, sub_m))
    if tk is None:
        tk = min(1024, _round_up(K, 128))
    if tn is None:
        tn = min(512, _round_up(N, 128))
    if tm % sub_m or tk % 128 or tn % 128:
        raise ValueError(
            f"tile sizes must satisfy tm % {sub_m} == 0 (compute dtype {cdt}), "
            f"tk % 128 == 0, tn % 128 == 0; got tm={tm}, tk={tk}, tn={tn}")

    Mp = _round_up(M, tm)
    # v7x megacore: if the (parallel) M x N grid would be 1x1, split N so both
    # TensorCores get work (only when tn was auto-picked).
    if auto_tn and (Mp // tm) == 1 and _round_up(N, tn) == tn and tn >= 256:
        tn //= 2
    Kp = _round_up(K, tk)
    Np = _round_up(N, tn)

    # --- operand prep -------------------------------------------------------
    x2d = x2d.astype(cdt)
    if (Mp, Kp) != (M, K):
        # zero-padding K is numerically safe for the contraction
        x2d = jnp.pad(x2d, ((0, Mp - M), (0, Kp - K)))

    # One-time weight prep: transpose (N,K) -> (K,N), cast, pad — fused by XLA.
    # Weight is constant across calls in a real module, so this belongs in
    # __init__ / a cached prepare step where it fully amortizes.
    # TODO(synk): hoist weight prep out of the per-call path when wrapping in a module.
    wT = weight.T.astype(cdt)
    if (Kp, Np) != (K, N):
        wT = jnp.pad(wT, ((0, Kp - K), (0, Np - N)))

    gm, gn, gk = Mp // tm, Np // tn, Kp // tk
    grid = (gm, gn, gk)   # reduction axis (K) last, carries the accumulator

    in_specs = [
        pl.BlockSpec((tm, tk), lambda i, j, k: (i, k)),   # x tile
        pl.BlockSpec((tk, tn), lambda i, j, k: (k, j)),   # weight tile (K, N)
    ]
    args = [x2d, wT]
    if bias is not None:
        b2d = bias.reshape(1, N).astype(jnp.float32)      # added in f32, once
        if Np != N:
            b2d = jnp.pad(b2d, ((0, 0), (0, Np - N)))
        in_specs.append(pl.BlockSpec((1, tn), lambda i, j, k: (0, j)))
        args.append(b2d)
        kernel = _linear_kernel_bias
    else:
        kernel = _linear_kernel_nobias

    out_item = jnp.dtype(out_dtype).itemsize
    out2d = pl.pallas_call(
        kernel,
        out_shape=jax.ShapeDtypeStruct((Mp, Np), out_dtype),
        grid_spec=pltpu.PrefetchScalarGridSpec(
            num_scalar_prefetch=0,
            grid=grid,
            in_specs=in_specs,
            out_specs=pl.BlockSpec((tm, tn), lambda i, j, k: (i, j)),
            scratch_shapes=[pltpu.VMEM((tm, tn), jnp.float32)],
        ),
        compiler_params=pltpu.CompilerParams(
            # M/N independent (megacore sharding on v7x); K carries the accumulator.
            dimension_semantics=("parallel", "parallel", "arbitrary"),
            vmem_limit_bytes=32 * 1024 * 1024,
        ),
        cost_estimate=pl.CostEstimate(
            flops=2 * M * N * K,
            transcendentals=0,
            # account for re-streaming: x read gn times, weight read gm times
            bytes_accessed=(M * K * gn + K * N * gm) * c_item
                           + (M * N + N) * out_item,
        ),
    )(*args)

    if (Mp, Np) != (M, N):
        out2d = out2d[:M, :N]
    return out2d.reshape(*lead, N)


def kaiming_init(key, scale, size):
    # matches: bound = 1/sqrt(scale); 2*rand(size)*bound - bound == U(-bound, bound)
    bound = 1.0 / jnp.sqrt(jnp.asarray(scale, dtype=jnp.float32))
    return jax.random.uniform(key, size, dtype=jnp.float32,
                              minval=-bound, maxval=bound)


if __name__ == "__main__":
    in_features, out_features = 256, 256
    batch, seq = 2, 8                    # leading dims (*) = (2, 8) -> M = 16

    key = jax.random.PRNGKey(0)
    kw, kb, kx = jax.random.split(key, 3)

    weight = kaiming_init(kw, in_features, (out_features, in_features))
    bias = kaiming_init(kb, in_features, (out_features,))
    x = jax.random.normal(kx, (batch, seq, in_features), dtype=jnp.float32)

    # plain-JAX references (tolerance loose enough for MXU precision differences)
    ref = x @ weight.T + bias
    ref_nb = x @ weight.T

    # 1) f32 path, auto tiles (megacore N-split -> grid (1, 2, 1))
    out = jax.block_until_ready(linear_forward(x, weight, bias))
    assert out.shape == (batch, seq, out_features)
    assert jnp.allclose(out, ref, atol=2e-2, rtol=2e-2)

    # 2) forced small tiles -> 2x2x2 grid: exercises the accumulator
    #    init / accumulate / finalize path across multiple K steps
    out_tiled = jax.block_until_ready(
        linear_forward(x, weight, bias, tm=8, tn=128, tk=128))
    assert jnp.allclose(out_tiled, ref, atol=2e-2, rtol=2e-2)

    # 3) no-bias path
    out_nb = jax.block_until_ready(linear_forward(x, weight, None))
    assert jnp.allclose(out_nb, ref_nb, atol=2e-2, rtol=2e-2)

    # 4) bf16 MXU datapath with f32 accumulation (the fast path on v5e/v6e/v7x)
    out_bf16 = jax.block_until_ready(
        linear_forward(x, weight, bias, compute_dtype=jnp.bfloat16))
    assert out_bf16.dtype == x.dtype
    assert jnp.allclose(out_bf16, ref, atol=6e-2, rtol=6e-2)

    print("KERNEL_OK")
</pallas_src>

<mosaic_0001>
module attributes {stable_mosaic.version = 11 : i64} {
  func.func @_linear_kernel_bias(%arg0: i32, %arg1: i32, %arg2: i32, %arg3: memref<16x256xf32, #tpu.memory_space<vmem>>, %arg4: memref<256x128xf32, #tpu.memory_space<vmem>>, %arg5: memref<1x128xf32, #tpu.memory_space<vmem>>, %arg6: memref<16x128xf32, #tpu.memory_space<vmem>>, %arg7: memref<16x128xf32, #tpu.memory_space<vmem>>) attributes {dimension_semantics = [#tpu.dimension_semantics<parallel>, #tpu.dimension_semantics<parallel>, #tpu.dimension_semantics<arbitrary>], iteration_bounds = array<i64: 1, 2, 1>, scalar_prefetch = 0 : i64, scratch_operands = 1 : i64, tpu.core_type = #tpu.core_type<tc>, window_params = [{transform_indices = @transform_0, window_bounds = array<i64: 16, 256>}, {transform_indices = @transform_1, window_bounds = array<i64: 256, 128>}, {transform_indices = @transform_2, window_bounds = array<i64: 1, 128>}, {transform_indices = @transform_3, window_bounds = array<i64: 16, 128>}]} {
    %c0_i32 = arith.constant 0 : i32
    %0 = arith.cmpi eq, %arg2, %c0_i32 : i32
    %1 = arith.extui %0 : i1 to i32
    %c0_i32_0 = arith.constant 0 : i32
    %2 = arith.cmpi ne, %1, %c0_i32_0 : i32
    scf.if %2 {
      %cst_10 = arith.constant 0.000000e+00 : f32
      %12 = vector.broadcast %cst_10 : f32 to vector<16x128xf32>
      %c0_11 = arith.constant 0 : index
      %c0_12 = arith.constant 0 : index
      %13 = vector.load %arg7[%c0_11, %c0_12] : memref<16x128xf32, #tpu.memory_space<vmem>>, vector<16x128xf32>
      tpu.vector_store %arg7[%c0_11, %c0_12], %12 {strides = array<i32>} : memref<16x128xf32, #tpu.memory_space<vmem>>, vector<16x128xf32>,
    } else {
    }
    %c0 = arith.constant 0 : index
    %c0_1 = arith.constant 0 : index
    %3 = vector.load %arg7[%c0, %c0_1] : memref<16x128xf32, #tpu.memory_space<vmem>>, vector<16x128xf32>
    %c0_2 = arith.constant 0 : index
    %c0_3 = arith.constant 0 : index
    %4 = vector.load %arg3[%c0_2, %c0_3] : memref<16x256xf32, #tpu.memory_space<vmem>>, vector<16x256xf32>
    %c0_4 = arith.constant 0 : index
    %c0_5 = arith.constant 0 : index
    %5 = vector.load %arg4[%c0_4, %c0_5] : memref<256x128xf32, #tpu.memory_space<vmem>>, vector<256x128xf32>
    %cst = arith.constant dense<0.000000e+00> : vector<16x128xf32>
    %6 = tpu.matmul %4, %5, %cst {dimension_numbers = #tpu.dot_dimension_numbers<[1], [0], [0], [1], [0, 0, 1, 1], [], []>} : vector<16x256xf32>, vector<256x128xf32>, vector<16x128xf32> -> vector<16x128xf32>
    %7 = arith.addf %3, %6 : vector<16x128xf32>
    %c0_6 = arith.constant 0 : index
    %c0_7 = arith.constant 0 : index
    %8 = vector.load %arg7[%c0_6, %c0_7] : memref<16x128xf32, #tpu.memory_space<vmem>>, vector<16x128xf32>
    tpu.vector_store %arg7[%c0_6, %c0_7], %7 {strides = array<i32>} : memref<16x128xf32, #tpu.memory_space<vmem>>, vector<16x128xf32>,
    %c0_i32_8 = arith.constant 0 : i32
    %9 = arith.cmpi eq, %arg2, %c0_i32_8 : i32
    %10 = arith.extui %9 : i1 to i32
    %c0_i32_9 = arith.constant 0 : i32
    %11 = arith.cmpi ne, %10, %c0_i32_9 : i32
    scf.if %11 {
      %c0_10 = arith.constant 0 : index
      %c0_11 = arith.constant 0 : index
      %12 = vector.load %arg7[%c0_10, %c0_11] : memref<16x128xf32, #tpu.memory_space<vmem>>, vector<16x128xf32>
      %c0_12 = arith.constant 0 : index
      %c0_13 = arith.constant 0 : index
      %13 = vector.load %arg5[%c0_12, %c0_13] : memref<1x128xf32, #tpu.memory_space<vmem>>, vector<1x128xf32>
      %14 = vector.broadcast %13 : vector<1x128xf32> to vector<16x128xf32>
      %15 = arith.addf %12, %14 : vector<16x128xf32>
      %c0_14 = arith.constant 0 : index
      %c0_15 = arith.constant 0 : index
      %16 = vector.load %arg6[%c0_14, %c0_15] : memref<16x128xf32, #tpu.memory_space<vmem>>, vector<16x128xf32>
      tpu.vector_store %arg6[%c0_14, %c0_15], %15 {strides = array<i32>} : memref<16x128xf32, #tpu.memory_space<vmem>>, vector<16x128xf32>,
    } else {
    }
    return
  }
  func.func @transform_0(%arg0: i32, %arg1: i32, %arg2: i32) -> (i32, i32) {
    %c0_i32 = arith.constant 0 : i32
    return %arg0, %arg2 : i32, i32
  }
  func.func @transform_1(%arg0: i32, %arg1: i32, %arg2: i32) -> (i32, i32) {
    %c0_i32 = arith.constant 0 : i32
    return %arg2, %arg1 : i32, i32
  }
  func.func @transform_2(%arg0: i32, %arg1: i32, %arg2: i32) -> (i32, i32) {
    %c0_i32 = arith.constant 0 : i32
    %c0_i32_0 = arith.constant 0 : i32
    return %c0_i32, %arg1 : i32, i32
  }
  func.func @transform_3(%arg0: i32, %arg1: i32, %arg2: i32) -> (i32, i32) {
    %c0_i32 = arith.constant 0 : i32
    return %arg0, %arg1 : i32, i32
  }
}

</mosaic_0001>

<bundles_post_ra>
// kernel: tpu_custom_call.1
= control target key start
LH: loop header
LB: loop body
LE: loop exit
PB: predicated region body
PF: predicated region fallthrough
CT: control target
= control target key end

     0   :  { %8 = vsyncpa [#allocation4], 0  ;;  %s1150_s0 = inlined_call_operand.hbm [shape: f32[16,256], index: 0, kind: input, shape index: {}]   ;;  %s1151_s1 = inlined_call_operand.hbm [shape: f32[256,256], index: 1, kind: input, shape index: {}]   ;;  %s1152_s2 = inlined_call_operand.vmem [shape: f32[1,256], index: 2, kind: input, shape index: {}]   ;;  %s1153_s3 = inlined_call_operand.hbm [shape: f32[16,256], index: 3, kind: output, shape index: {}]  }
   0x1   :  { %9 = vsyncpa [#allocation7], 0 }
   0x2   :  { %11 = vsyncpa [#allocation7 + $0x1], 0 }
   0x3   :  { %12 = vsyncpa [#allocation5], 0 }
   0x4   :  { %14 = vsyncpa [#allocation5 + $0x1], 0  ;;  %s887_s12 = smov 0   ;;  %s889_s13 = smov 0  }
   0x5   :  { %s891_s14 = smov 0   ;;  %s893_s15 = smov 0  }
   0x6   :  { %s895_s16 = smov 0   ;;  %s897_s17 = smov 0  }
   0x7 LB: > { %s529_s18 = sadd.s32 4294967295, %s855_s17   ;;  %s530_s19 = sadd.s32 4294967294, %s855_s17   ;;  %s855_s17 = sphi %s897_s17, %s20_s17   ;;  %s851_s16 = sphi %s895_s16, %s1179_s16   ;;  %s847_s15 = sphi %s893_s15, %s1178_s15   ;;  %s843_s14 = sphi %s891_s14, %s1177_s14   ;;  %s839_s13 = sphi %s889_s13, %s1176_s13   ;;  %s835_s12 = sphi %s887_s12, %s1175_s12  }
   0x8   : > { %p83_p0 = scmp.ne.s32.totalorder %s843_s14, %s839_s13  ;;  %p84_p1 = scmp.eq.s32.totalorder %s855_s17, 0 }
   0x9   : > { %p89_p2 = scmp.ne.s32.totalorder %s839_s13, %s835_s12  ;;  %p924_p3 = scmp.eq.s32.totalorder %s529_s18, 0 }
   0xa   : > { %p928_p4 = por %p84_p1, %p83_p0  ;;  %p141_p5 = scmp.eq.s32.totalorder %s529_s18, 1 }
   0xb   : > { %s1160_s20 = scalar_select %p924_p3, 1, 0 }
   0xc   : > { %p934_p6 = por %p924_p3, %p89_p2  ;;  %p147_p7 = scmp.eq.s32.totalorder %s530_s19, 1 }
   0xd   : > { %p938_p8 = por %p141_p5, %p83_p0  ;;  %p531_p9 = scmp.ge.s32.totalorder %s855_s17, 1 }
   0xe   : > { %s1162_s22 = scalar_select %p934_p6, 1, 0 }
   0xf   : > { %s1163_s23 = scalar_select %p938_p8, 1, 0 }
  0x10   : > { %p943_p10 = por %p147_p7, %p89_p2  ;;  %p154_p11 = scmp.lt.s32.totalorder %s855_s17, 3 }
  0x11   : > { %s857_s26 = smov [#allocation3]   ;;  %p652_p1 = scmp.lt.s32.totalorder %s855_s17, 2 }
  0x12   : > { %s1164_s24 = scalar_select %p943_p10, 1, 0 }
  0x13   : > { %p948_p12 = pnand %p531_p9, %p154_p11  ;;  %s172_s27 = sshll.u32 %s857_s26, 4  ;;  %s952_s27 = int_to_ptr.vmem [resolvable:$true] %s172_s27 }
  0x14   : > { %p966_p2 = pnand %p652_p1, %p928_p4  ;;  %s35_s30 = sadd.s32 1, %s851_s16 }
  0x15   : > { %s1165_s25 = scalar_select %p948_p12, 1, 0 }
  0x16   : > { %p639_p13 = pneg %p948_p12  ;;  %s711_s6 = scalar_lea.hbm %s1150_s0, 512 }
  0x17   : > { %s1167_s29 = scalar_select %p966_p2, 1, 0 }
  0x18   : > { %p960_p5 = pnand %p639_p13, %p924_p3  ;;  %p712_p7 = scmp.ne.s32.totalorder %s1150_s0, %s711_s6 }
  0x19   : > { %p718_p4 = scmp.lt.u32.totalorder %s711_s6, %s1150_s0 }
  0x1a   : > { %p713_p9 = pneg %p960_p5 }
  0x1c   : > { %p714_p11 = pnand %p713_p9, %p712_p7 }
  0x1e   : > { %p715_p13 = pneg %p714_p11 }
  0x20   : > { %p720_p1 = pnand %p718_p4, %p715_p13 }
  0x22   : > { %723 = shalt.err (!%p720_p1)
}
  0x23   : > { %s724_s11 = scalar_lea.vmem %s952_s27, 512  ;;  %p732_p6 = scmp.lt.s32.totalorder %s952_s27, %s952_s27 }
  0x24   : > { %p725_p0 = scmp.ne.s32.totalorder %s952_s27, %s724_s11  ;;  %p733_p3 = scmp.lt.s32.totalorder %s724_s11, %s724_s11 }
  0x26   : > { %p727_p10 = pnand %p725_p0, %p713_p9  ;;  %p734_p12 = por %p733_p3, %p732_p6 }
  0x28   : > { %p728_p8 = pneg %p727_p10 }
  0x2a   : > { %p735_p2 = pnand %p734_p12, %p728_p8 }
  0x2c   : > { %738 = shalt.err (!%p735_p2)
}
  0x2d   : > { %s858_s18 = smov 256   ;;  %s859_s19 = smov 16  }
  0x2e   : > { %642 = dma.hbm_to_vmem [thread:$0]  (!%p960_p5), %s1150_s0, 512, %s952_s27, [#allocation4], %s858_s18, %s858_s18, %s859_s19  }
  0x2f   : > { %p37_p10 = scmp.ge.s32.totalorder %s35_s30, 2  ;;  %s76_s4 = sadd.s32 1, %s843_s14 }
  0x30   : > { %s186_s5 = sand.u32 1, %s843_s14   ;;  %s535_s8 = sshll.u32 %s851_s16, 7 }
  0x31   : > { %s1181_s30 = smov (%p37_p10, %s35_s30), 0  ;;  %s534_s6 = sshll.u32 %s186_s5, 8 }
  0x32   : > { %s72_s7 = ssub.s32 %s851_s16, %s1181_s30  ;;  %s1004_s10 = scalar_lea.hbm %s1151_s1, %s535_s8 }
  0x33   : > { %p74_p3 = scmp.eq.s32.totalorder %s72_s7, 0  ;;  %s190_s27 = scalar_lea.vmem [#allocation6], %s534_s6 }
  0x34   : > { %s199_s11 = sshll.u32 %s190_s27, 4  ;;  %s1011_s21 = scalar_lea.sflag [#allocation7], %s186_s5  ;;  %s1009_s11 = int_to_ptr.vmem [resolvable:$true] %s199_s11 }
  0x35   : > { %s1007_s19 = scalar_select %p74_p3, %s843_s14, %s76_s4  }
  0x36   : > { %s739_s26 = scalar_lea.hbm %s1004_s10, 4096  ;;  %p1168_p8 = scmp.ne.s32.totalorder %s1167_s29, 0 }
  0x37   : > { %p740_p6 = scmp.ne.s32.totalorder %s1004_s10, %s739_s26  ;;  %s744_s9 = scalar_lea.hbm %s1151_s1, 8192 }
  0x38   : > { %p741_p12 = pneg %p1168_p8  ;;  %p745_p2 = scmp.lt.u32.totalorder %s1004_s10, %s1151_s1 }
  0x39   : > { %p746_p7 = scmp.lt.u32.totalorder %s744_s9, %s739_s26  ;;  %p748_p11 = scmp.lt.u32.totalorder %s739_s26, %s1004_s10 }
  0x3a   : > { %p742_p0 = pnand %p741_p12, %p740_p6 }
  0x3b   : > { %p747_p9 = por %p746_p7, %p745_p2 }
  0x3c   : > { %p743_p5 = pneg %p742_p0 }
  0x3d   : > { %p749_p13 = por %p748_p11, %p747_p9 }
  0x3f   : > { %p750_p4 = pnand %p749_p13, %p743_p5 }
  0x41   : > { %753 = shalt.err (!%p750_p4)
}
  0x42   : > { %s754_s4 = scalar_lea.vmem %s1009_s11, 4096  ;;  %s860_s5 = smov [#allocation6]  }
  0x43   : > { %p755_p1 = scmp.ne.s32.totalorder %s1009_s11, %s754_s4  ;;  %s759_s27 = sshll.u32 %s860_s5, 4  ;;  %s760_s27 = int_to_ptr.vmem [resolvable:$false] %s759_s27 }
  0x44   : > { %s761_s7 = scalar_lea.vmem %s760_s27, 8192  ;;  %p762_p6 = scmp.lt.s32.totalorder %s1009_s11, %s760_s27 }
  0x45   : > { %p757_p10 = pnand %p755_p1, %p741_p12  ;;  %p763_p0 = scmp.lt.s32.totalorder %s761_s7, %s754_s4 }
  0x47   : > { %p758_p3 = pneg %p757_p10  ;;  %p764_p2 = por %p763_p0, %p762_p6 }
  0x49   : > { %p765_p7 = pnand %p764_p2, %p758_p3 }
  0x4b   : > { %768 = shalt.err (!%p765_p7)
}
  0x4c   : > { %s861_s26 = smov 128   ;;  %s862_s8 = smov 8  }
  0x4d   : > { %646 = dma.hbm_to_vmem [thread:$0]  (!%p1168_p8), %s1004_s10, 4096, %s1009_s11, %s1011_s21, %s858_s18, %s861_s26, %s862_s8  }
  0x4e   : > { %p1169_p12 = scmp.ne.s32.totalorder %s1165_s25, 0 }
  0x4f   : > { %p1170_p5 = scmp.ne.s32.totalorder (!%p1169_p12), %s1160_s20, 0 }
  0x50   : > { %217 = sbr.rel (%p1169_p12) target bundleno = 360 (0x168), region = 32 }
  0x57   : > { %822 = dma.done.wait (%p1170_p5), [#allocation4], 512  }
  0x58   : > { %824 = vsyncadd (%p1170_p5), [#allocation4], 4294966784  ;;  %s1047_s9 = sand.u32 1, %s839_s13   ;;  %p1171_p8 = scmp.ne.s32.totalorder %s1162_s22, 0 }
  0x59   : > { %s538_s6 = sshll.u32 %s1047_s9, 8  ;;  %s224_s28 = scalar_lea.sflag [#allocation7], %s1047_s9 }
  0x5a   : > { %s1051_s29 = scalar_lea.vmem [#allocation6], %s538_s6 }
  0x5b   : > { %826 = dma.done.wait (%p1171_p8), %s224_s28, 4096  }
  0x5c   : > { %828 = vsyncadd (%p1171_p8), %s224_s28, 4294963200  ;;  %v288_v0 = vld [vmem:[%s1051_s29 + $0x80] sm:$0xff]  ;;  %v289_v1 = vld [vmem:[%s1051_s29 + $0x88] sm:$0xff]  ;;  %p256_p9 = scmp.lt.s32.totalorder %s847_s15, 1  ;;  %s539_s20 = sshll.u32 %s1047_s9, 4 }
  0x5d   : > { %v272_v2 = vld [vmem:[%s1051_s29] sm:$0xff]  ;;  %v583_v3 = vpack.c.bf16 %v289_v1, %v288_v0  ;;  %v273_v4 = vld [vmem:[%s1051_s29 + $0x8] sm:$0xff]  ;;  %v290_v5 = vld [vmem:[%s1051_s29 + $0x90] sm:$0xff]  ;;  %s252_s11 = scalar_lea.vmem [#allocation8], %s539_s20  ;;  %s542_s4 = sshll.u32 %s847_s15, 7 }
  0x5e   : > { %v291_v6 = vld [vmem:[%s1051_s29 + $0x98] sm:$0xff]  ;;  %v585_v7 = vpack.c.bf16 %v273_v4, %v272_v2  ;;  %v274_v9 = vld [vmem:[%s1051_s29 + $0x10] sm:$0xff]  ;;  %v292_v11 = vld [vmem:[%s1051_s29 + $0xa0] sm:$0xff]  ;;  %s257_s22 = scalar_select %p256_p9, %s847_s15, 1 }
  0x5f   : > { %v587_v8 = vpack.c.bf16 %v291_v6, %v290_v5  ;;  %v275_v10 = vld [vmem:[%s1051_s29 + $0x18] sm:$0xff]  ;;  %584 = vmatprep.subr.bf16.mxu0 %v583_v3  ;;  %615 = vmatprep.subr.bf16.mxu1 %v583_v3  ;;  %v293_v12 = vld [vmem:[%s1051_s29 + $0xa8] sm:$0xff]  ;;  %v276_v15 = vld [vmem:[%s1051_s29 + $0x20] sm:$0xff]  ;;  %s415_s21 = sshll.u32 %s252_s11, 4  ;;  %s1101_s7 = scalar_lea.hbm %s1153_s3, %s542_s4  ;;  %s1096_s21 = int_to_ptr.vmem [resolvable:$true] %s415_s21 }
  0x60   : > { %586 = vmatpush3.bf16.msra.mxu0 %v585_v7  ;;  %623 = vmatpush3.bf16.msra.mxu1 %v585_v7  ;;  %v589_v13 = vpack.c.bf16 %v275_v10, %v274_v9  ;;  %v591_v14 = vpack.c.bf16 %v293_v12, %v292_v11  ;;  %v277_v16 = vld [vmem:[%s1051_s29 + $0x28] sm:$0xff]  ;;  %v294_v17 = vld [vmem:[%s1051_s29 + $0xb0] sm:$0xff]  ;;  %v295_v18 = vld [vmem:[%s1051_s29 + $0xb8] sm:$0xff]  ;;  %s258_s10 = scalar_lea.vmem %s1152_s2, %s257_s22  ;;  %s400_s15 = scalar_lea.sflag [#allocation5], %s1047_s9 }
  0x61   : > { %588 = vmatprep.subr.bf16.mxu0 %v587_v8  ;;  %616 = vmatprep.subr.bf16.mxu1 %v587_v8  ;;  %v593_v19 = vpack.c.bf16 %v277_v16, %v276_v15  ;;  %v595_v20 = vpack.c.bf16 %v295_v18, %v294_v17  ;;  %v278_v21 = vld [vmem:[%s1051_s29 + $0x30] sm:$0xff]  ;;  %v279_v22 = vld [vmem:[%s1051_s29 + $0x38] sm:$0xff]  ;;  %v296_v23 = vld [vmem:[%s1051_s29 + $0xc0] sm:$0xff]  ;;  %s769_s26 = scalar_lea.vmem %s1096_s21, 256  ;;  %p1172_p13 = scmp.ne.s32.totalorder %s1163_s23, 0 }
  0x62   : > { %v297_v24 = vld [vmem:[%s1051_s29 + $0xc8] sm:$0xff]  ;;  %v271_v26 = vld [vmem:[#allocation3 + $0x18] sm:$0xff]  ;;  %v597_v27 = vpack.c.bf16 %v279_v22, %v278_v21  ;;  %v280_v29 = vld [vmem:[%s1051_s29 + $0x40] sm:$0xff]  ;;  %p770_p11 = scmp.ne.s32.totalorder %s1096_s21, %s769_s26  ;;  %s863_s8 = smov [#allocation8]  }
  0x63   : > { %v269_v25 = vld [vmem:[#allocation3 + $0x8] sm:$0xff]  ;;  %v599_v28 = vpack.c.bf16 %v297_v24, %v296_v23  ;;  %v298_v31 = vld [vmem:[%s1051_s29 + $0xd0] sm:$0xff]  ;;  %v299_v32 = vld [vmem:[%s1051_s29 + $0xd8] sm:$0xff]  ;;  %373 = vmatprep.mubr.f32.mxu1 %v271_v26  ;;  %s773_s6 = sshll.u32 %s863_s8, 4  ;;  %s774_s6 = int_to_ptr.vmem [resolvable:$false] %s773_s6 }
  0x64   : > { %590 = vmatpush3.bf16.msra.mxu0 %v589_v13  ;;  %624 = vmatpush3.bf16.msra.mxu1 %v589_v13  ;;  %v281_v30 = vld [vmem:[%s1051_s29 + $0x48] sm:$0xff]  ;;  %v603_v34 = vpack.c.bf16 %v299_v32, %v298_v31  ;;  %v282_v35 = vld [vmem:[%s1051_s29 + $0x50] sm:$0xff]  ;;  %v283_v36 = vld [vmem:[%s1051_s29 + $0x58] sm:$0xff]  ;;  %p771_p4 = pnand %p770_p11, %p1172_p13  ;;  %s775_s28 = scalar_lea.vmem %s774_s6, 512 }
  0x65   : > { %592 = vmatprep.subr.bf16.mxu0 %v591_v14  ;;  %617 = vmatprep.subr.bf16.mxu1 %v591_v14  ;;  %v601_v33 = vpack.c.bf16 %v281_v30, %v280_v29  ;;  %v300_v37 = vld [vmem:[%s1051_s29 + $0xe0] sm:$0xff]  ;;  %v301_v38 = vld [vmem:[%s1051_s29 + $0xe8] sm:$0xff]  ;;  %v605_v39 = vpack.c.bf16 %v283_v36, %v282_v35  ;;  %v302_v43 = vld [vmem:[%s1051_s29 + $0xf0] sm:$0xff]  ;;  %p776_p10 = scmp.lt.s32.totalorder %s1096_s21, %s774_s6  ;;  %p777_p3 = scmp.lt.s32.totalorder %s775_s28, %s769_s26 }
  0x66   : > { %368 = vmatprep.mubr.f32.mxu0 %v269_v25  ;;  %v607_v40 = vpack.c.bf16 %v301_v38, %v300_v37  ;;  %v284_v41 = vld [vmem:[%s1051_s29 + $0x60] sm:$0xff]  ;;  %v285_v42 = vld [vmem:[%s1051_s29 + $0x68] sm:$0xff]  ;;  %v303_v44 = vld [vmem:[%s1051_s29 + $0xf8] sm:$0xff]  ;;  %p772_p1 = pneg %p771_p4 }
  0x67   : > { %v609_v45 = vpack.c.bf16 %v285_v42, %v284_v41  ;;  %v611_v46 = vpack.c.bf16 %v303_v44, %v302_v43  ;;  %v286_v47 = vld [vmem:[%s1051_s29 + $0x70] sm:$0xff]  ;;  %v287_v48 = vld [vmem:[%s1051_s29 + $0x78] sm:$0xff]  ;;  %v268_v50 = vld [vmem:[#allocation3] sm:$0xff]  ;;  %p778_p6 = por %p777_p3, %p776_p10 }
  0x68   : > { %594 = vmatpush3.bf16.msra.mxu0 %v593_v19  ;;  %625 = vmatpush3.bf16.msra.mxu1 %v593_v19  ;;  %v613_v49 = vpack.c.bf16 %v287_v48, %v286_v47  ;;  %v270_v51 = vld [vmem:[#allocation3 + $0x10] sm:$0xff]  ;;  %v540_v55 = vld [vmem:[%s258_s10] ss:$0 sm:$0xff] }
  0x69   : > { %596 = vmatprep.subr.bf16.mxu0 %v595_v20  ;;  %618 = vmatprep.subr.bf16.mxu1 %v595_v20  ;;  %p779_p0 = pnand %p778_p6, %p772_p1 }
  0x6c   : > { %598 = vmatpush3.bf16.msra.mxu0 %v597_v27  ;;  %626 = vmatpush3.bf16.msra.mxu1 %v597_v27 }
  0x6d   : > { %600 = vmatprep.subr.bf16.mxu0 %v599_v28  ;;  %619 = vmatprep.subr.bf16.mxu1 %v599_v28 }
  0x70   : > { %602 = vmatpush3.bf16.msra.mxu0 %v601_v33  ;;  %627 = vmatpush3.bf16.msra.mxu1 %v601_v33 }
  0x71   : > { %604 = vmatprep.subr.bf16.mxu0 %v603_v34  ;;  %620 = vmatprep.subr.bf16.mxu1 %v603_v34 }
  0x74   : > { %606 = vmatpush3.bf16.msra.mxu0 %v605_v39  ;;  %628 = vmatpush3.bf16.msra.mxu1 %v605_v39 }
  0x75   : > { %608 = vmatprep.subr.bf16.mxu0 %v607_v40  ;;  %621 = vmatprep.subr.bf16.mxu1 %v607_v40 }
  0x78   : > { %610 = vmatpush3.bf16.msra.mxu0 %v609_v45  ;;  %629 = vmatpush3.bf16.msra.mxu1 %v609_v45 }
  0x79   : > { %612 = vmatprep.subr.bf16.mxu0 %v611_v46  ;;  %622 = vmatprep.subr.bf16.mxu1 %v611_v46 }
  0x7c   : > { %614 = vmatpush3.bf16.msra.mxu0 %v613_v49  ;;  %630 = vmatpush3.bf16.msra.mxu1 %v613_v49 }
  0x7f   : > { %369 = vmatmul.mubr.f32.vlgmr.msra.gmra.mrb[0].mxu0 %v268_v50  ;;  %374 = vmatmul.mubr.f32.vlgmr.msra.gmra.mrb[0].mxu1 %v270_v51 }
 0x152   : > { %v577_v52 = vpop.f32.mrb[0].mxu0  ;;  %v580_v53 = vpop.f32.mrb[0].mxu1 }
 0x153   : > { %v578_v54 = vpop.f32.mrb[1].mxu0  ;;  %v581_v56 = vpop.f32.mrb[1].mxu1 }
 0x154   : > { %v579_v57 = vadd.f32 %v578_v54, %v577_v52  ;;  %v582_v58 = vadd.f32 %v581_v56, %v580_v53 }
 0x156   : > { %v395_v59 = vadd.f32 %v579_v57, %v540_v55  ;;  %v396_v60 = vadd.f32 %v582_v58, %v540_v55 }
 0x158   : > { %397 = vst [vmem:[%s252_s11] sm:$0xff] %v395_v59  ;;  %398 = vst [vmem:[%s252_s11 + $0x8] sm:$0xff] %v396_v60 }
 0x159   : > { %782 = shalt.err (!%p779_p0)
}
 0x15a   : > { %s783_s29 = scalar_lea.hbm %s1101_s7, 256  ;;  %s787_s25 = scalar_lea.hbm %s1153_s3, 512 }
 0x15b   : > { %p784_p2 = scmp.ne.s32.totalorder %s1101_s7, %s783_s29  ;;  %p788_p5 = scmp.lt.u32.totalorder %s1101_s7, %s1153_s3 }
 0x15c   : > { %p789_p8 = scmp.lt.u32.totalorder %s787_s25, %s783_s29  ;;  %p791_p11 = scmp.lt.u32.totalorder %s783_s29, %s1101_s7 }
 0x15d   : > { %p785_p7 = pnand %p784_p2, %p1172_p13 }
 0x15e   : > { %p790_p9 = por %p789_p8, %p788_p5 }
 0x15f   : > { %p786_p12 = pneg %p785_p7 }
 0x160   : > { %p792_p4 = por %p791_p11, %p790_p9 }
 0x162   : > { %p793_p1 = pnand %p792_p4, %p786_p12 }
 0x164   : > { %796 = shalt.err (!%p793_p1)
}
 0x165   : > { %s864_s11 = smov 128   ;;  %s865_s4 = smov 256  }
 0x166   : > { %s866_s5 = smov 8  }
 0x167   : > { %637 = dma.vmem_to_hbm [thread:$0]  (%p1172_p13), %s1096_s21, 256, %s1101_s7, %s400_s15, %s864_s11, %s865_s4, %s866_s5  }
 0x168 PF: > { %s430_s27 = sand.u32 1, %s835_s12   ;;  %p1173_p10 = scmp.ne.s32.totalorder %s1164_s24, 0 }
 0x169   : > { %p1174_p3 = scmp.ge.s32.totalorder %s855_s17, 2  ;;  %s431_s26 = scalar_lea.sflag [#allocation5], %s430_s27 }
 0x16b   : > { %p648_p6 = pnand %p1174_p3, %p1173_p10 }
 0x16d   : > { %830 = dma.done.wait (!%p648_p6), %s431_s26, 256  }
 0x16e   : > { %832 = vsyncadd (!%p648_p6), %s431_s26, 4294967040  ;;  %s20_s17 = sadd.s32 1, %s855_s17   ;;  %s1175_s12 = smov %s839_s13 }
 0x16f   : > { %p17_p0 = scmp.ge.s32.totalorder %s20_s17, 4   ;;  %s1176_s13 = smov %s843_s14 }
 0x170   : > { %s1177_s14 = smov %s1007_s19  ;;  %s1178_s15 = smov %s851_s16 }
 0x171   : > { %s1179_s16 = smov %s1181_s30  ;;  %19 = sbr.rel (!%p17_p0) target bundleno = 7 (0x7), region = 94 }
 0x178   :  { %436 = vsyncpa [#allocation4], 1 }
 0x179   :  { %438 = vsyncpa [#allocation4 + $0x1], 1 }
 0x17a   :  { %439 = vsyncpa [#allocation7], 1 }
 0x17b   :  { %441 = vsyncpa [#allocation7 + $0x1], 1 }
 0x17c   :  { %442 = vsyncpa [#allocation5], 1 }
 0x17d   :  { %444 = vsyncpa [#allocation5 + $0x1], 1 }

</bundles_post_ra>
